<compile_context>
chip_gen: v5e
topology: v5e:2x2
jax: 0.10.0
libtpu: 0.0.40
codegen_flags: <defaults>
</compile_context>

<pallas_src>
import math

import jax
import jax.numpy as jnp
from jax.experimental import pallas as pl
from jax.experimental.pallas import tpu as pltpu

_LANES = 128


def _build_pe(d_model: int, max_sequence_length: int = 1024) -> jnp.ndarray:
    """Deterministic sinusoidal positional-encoding buffer, shape (1, L, D)."""
    position = jnp.arange(max_sequence_length, dtype=jnp.float32)[:, None]       # (L, 1)
    div_term = jnp.exp(
        jnp.arange(0, d_model, 2, dtype=jnp.float32) * (-math.log(10000.0) / d_model)
    )                                                                             # (D/2,)
    angles = position * div_term                                                  # (L, D/2)
    pe = jnp.zeros((max_sequence_length, d_model), dtype=jnp.float32)
    pe = pe.at[:, 0::2].set(jnp.sin(angles))
    pe = pe.at[:, 1::2].set(jnp.cos(angles))
    return pe[None, :, :]                                                         # (1, L, D)


def prepare_pe_slice(pe: jnp.ndarray, seq_len: int) -> jnp.ndarray:
    """Hoist the per-call pe slice out of the forward path (call once per S)."""
    return pe[0, :seq_len, :]                                                     # (S, D) fp32


def _pe_add_kernel(x_ref, pe_ref, o_ref):
    # x_ref / o_ref: (TB, TILE_R, W);  pe_ref: (TILE_R, W) fp32.  Pure VPU add.
    x = x_ref[...].astype(jnp.float32)
    o_ref[...] = (x + pe_ref[...][None, :, :]).astype(o_ref.dtype)


def _vmem_budget():
    """(vmem_limit_bytes, target_block_bytes) gated by TPU generation."""
    cap = None
    try:
        cap = getattr(pltpu.get_tpu_info(), "vmem_capacity_bytes", None)
    except Exception:
        cap = None
    if cap is None:
        cap = 64 * 1024 * 1024                       # conservative: assume v7x
    if cap >= 128 * 1024 * 1024:                     # v5e / v6e (128 MiB VMEM)
        return 64 * 1024 * 1024, 8 * 1024 * 1024
    return 48 * 1024 * 1024, 6 * 1024 * 1024         # v7x (64 MiB VMEM)


def positional_encoding_forward(
    x: jnp.ndarray,
    pe_s: jnp.ndarray,
    *,
    target_block_bytes: int | None = None,
    vmem_limit_bytes: int | None = None,
    force_pallas: bool = False,
    min_pallas_bytes: int = 256 * 1024,
) -> jnp.ndarray:
    """x: (B, S, D); pe_s: (S, D) fp32 (prepared via prepare_pe_slice)."""
    B, S, D = x.shape
    assert pe_s.shape == (S, D), "pe_s must be the pre-sliced (S, D) buffer"

    itemsize = jnp.dtype(x.dtype).itemsize
    total_bytes = B * S * D * itemsize

    # Tiny-activation escape hatch: let XLA fuse the add into the caller.
    if not force_pallas and total_bytes < min_pallas_bytes:
        return (x.astype(jnp.float32) + pe_s[None, :, :]).astype(x.dtype)

    # --- choose a lane-dense 2-D view of each per-batch slab -----------------
    pad = 0
    if D % _LANES == 0:
        R, W = S, D
        x2, pe2 = x, pe_s
    elif (S * D) % _LANES == 0:
        # Lane-sparse D (e.g. 32): flatten each (S, D) slab to (R, 128).
        W = _LANES
        R = (S * D) // _LANES
        x2 = x.reshape(B, R, W)
        pe2 = pe_s.reshape(R, W)
    else:
        # Awkward shape: pad last dim up to a lane multiple (keeps stores as
        # unmasked `vst`); the padded tail is sliced off after the call.
        pad = (-D) % _LANES
        R, W = S, D + pad
        x2 = jnp.pad(x, ((0, 0), (0, 0), (0, pad)))
        pe2 = jnp.pad(pe_s, ((0, 0), (0, pad)))

    # --- generation-gated budgets --------------------------------------------
    auto_vmem, auto_target = _vmem_budget()
    vmem_limit = vmem_limit_bytes if vmem_limit_bytes is not None else auto_vmem
    target = target_block_bytes if target_block_bytes is not None else auto_target

    sublane = max(8, 32 // itemsize)                 # 8 for f32, 16 for bf16, ...
    slab_bytes = R * W * itemsize

    # --- pick (tb, tile_r): ~target bytes per block --------------------------
    if slab_bytes >= target:
        tb = 1
        rows_budget = max(sublane, target // (W * itemsize))
        tile_r = min(R, max(sublane, (rows_budget // sublane) * sublane))
    else:
        # Small per-batch slab: fold several batch elements into one block so
        # the per-grid-step overhead is amortized (pe broadcast in-kernel).
        tile_r = R
        tb = max(1, min(B, target // max(1, slab_bytes)))

    # Double-buffered footprint: x + out (x.dtype) and pe (fp32), all 2-deep.
    def _footprint(tb_, tr_):
        return 4 * tb_ * tr_ * W * itemsize + 2 * tr_ * W * 4

    budget = int(vmem_limit * 0.85)
    while _footprint(tb, tile_r) > budget:
        if tb > 1:
            tb = (tb + 1) // 2
        elif tile_r > sublane:
            tile_r = max(sublane, ((tile_r // 2) // sublane) * sublane)
        else:
            break

    n_row_tiles = -(-R // tile_r)
    n_batch_tiles = -(-B // tb)

    # v7x has 2 TensorCores: don't leave one idle on a (1, 1) grid when the
    # problem is big enough to be worth splitting.
    if (n_row_tiles * n_batch_tiles == 1 and total_bytes >= (1 << 20)
            and R >= 2 * sublane):
        half = max(sublane, (((R + 1) // 2 + sublane - 1) // sublane) * sublane)
        if half < R:
            tile_r = half
            n_row_tiles = -(-R // tile_r)

    # Grid order (row_tiles, batch_tiles): pe's block index is constant across
    # the inner batch loop, so pe is not re-DMA'd per batch tile.
    grid_spec = pltpu.PrefetchScalarGridSpec(
        num_scalar_prefetch=0,
        grid=(n_row_tiles, n_batch_tiles),
        in_specs=[
            pl.BlockSpec((tb, tile_r, W), lambda s, b: (b, s, 0)),   # x tile
            pl.BlockSpec((tile_r, W), lambda s, b: (s, 0)),          # pe tile (fp32)
        ],
        out_specs=pl.BlockSpec((tb, tile_r, W), lambda s, b: (b, s, 0)),
    )

    out = pl.pallas_call(
        _pe_add_kernel,
        out_shape=jax.ShapeDtypeStruct((B, R, W), x.dtype),
        grid_spec=grid_spec,
        compiler_params=pltpu.CompilerParams(
            dimension_semantics=("parallel", "parallel"),
            vmem_limit_bytes=vmem_limit,
        ),
        # Shape/dtype-preserving elementwise op: reuse x's buffer for the
        # output when x is donatable (no extra B*S*D HBM output allocation).
        input_output_aliases={0: 0},
    )(x2, pe2)

    if pad:
        return out[:, :, :D]
    return out.reshape(B, S, D)


if __name__ == "__main__":
    MAX_LEN = 1024
    k0, k1, k2 = jax.random.split(jax.random.PRNGKey(0), 3)

    # Case 1: module-scale small shapes (B=2, S=8, D=32) -> flattened-lane path
    # with batch blocking (forced through the kernel despite being tiny).
    B, S, D = 2, 8, 32
    x = jax.random.normal(k0, (B, S, D), dtype=jnp.float32)
    pe = _build_pe(D, MAX_LEN)
    pe_s = prepare_pe_slice(pe, S)
    ref = x + pe[:, :S]
    out = jax.block_until_ready(positional_encoding_forward(x, pe_s, force_pallas=True))
    assert out.shape == (B, S, D)
    assert jnp.allclose(out, ref, atol=1e-6), "mismatch vs. reference (flat path)"

    # Case 2: lane-dense D with multiple row tiles (tiled + pe-amortized path).
    B2, S2, D2 = 2, 64, 128
    xb = jax.random.normal(k1, (B2, S2, D2), dtype=jnp.float32)
    peb = _build_pe(D2, MAX_LEN)
    peb_s = prepare_pe_slice(peb, S2)
    refb = xb + peb[:, :S2]
    outb = jax.block_until_ready(
        positional_encoding_forward(
            xb, peb_s, target_block_bytes=16 * 1024, force_pallas=True
        )
    )
    assert outb.shape == (B2, S2, D2)
    assert jnp.allclose(outb, refb, atol=1e-6), "mismatch vs. reference (tiled path)"

    # Case 3: awkward D (neither D nor S*D a lane multiple) -> padded-lane path.
    B3, S3, D3 = 2, 8, 40
    xc = jax.random.normal(k2, (B3, S3, D3), dtype=jnp.float32)
    pec = _build_pe(D3, MAX_LEN)
    pec_s = prepare_pe_slice(pec, S3)
    refc = xc + pec[:, :S3]
    outc = jax.block_until_ready(positional_encoding_forward(xc, pec_s, force_pallas=True))
    assert outc.shape == (B3, S3, D3)
    assert jnp.allclose(outc, refc, atol=1e-6), "mismatch vs. reference (padded path)"

    print("KERNEL_OK")
</pallas_src>

<mosaic_0001>
module attributes {stable_mosaic.version = 11 : i64} {
  func.func @_pe_add_kernel(%arg0: i32, %arg1: i32, %arg2: memref<2x2x128xf32, #tpu.memory_space<vmem>>, %arg3: memref<2x128xf32, #tpu.memory_space<vmem>>, %arg4: memref<2x2x128xf32, #tpu.memory_space<vmem>>) attributes {dimension_semantics = [#tpu.dimension_semantics<parallel>, #tpu.dimension_semantics<parallel>], iteration_bounds = array<i64: 1, 1>, scalar_prefetch = 0 : i64, scratch_operands = 0 : i64, tpu.core_type = #tpu.core_type<tc>, window_params = [{transform_indices = @transform_0, window_bounds = array<i64: 2, 2, 128>}, {transform_indices = @transform_1, window_bounds = array<i64: 2, 128>}, {transform_indices = @transform_2, window_bounds = array<i64: 2, 2, 128>}]} {
    %c0 = arith.constant 0 : index
    %c0_0 = arith.constant 0 : index
    %c0_1 = arith.constant 0 : index
    %0 = vector.load %arg2[%c0, %c0_0, %c0_1] : memref<2x2x128xf32, #tpu.memory_space<vmem>>, vector<2x2x128xf32>
    %c0_2 = arith.constant 0 : index
    %c0_3 = arith.constant 0 : index
    %1 = vector.load %arg3[%c0_2, %c0_3] : memref<2x128xf32, #tpu.memory_space<vmem>>, vector<2x128xf32>
    %2 = vector.shape_cast %1 : vector<2x128xf32> to vector<1x2x128xf32>
    %3 = vector.broadcast %2 : vector<1x2x128xf32> to vector<2x2x128xf32>
    %4 = arith.addf %0, %3 : vector<2x2x128xf32>
    %c0_4 = arith.constant 0 : index
    %c0_5 = arith.constant 0 : index
    %c0_6 = arith.constant 0 : index
    %5 = vector.load %arg4[%c0_4, %c0_5, %c0_6] : memref<2x2x128xf32, #tpu.memory_space<vmem>>, vector<2x2x128xf32>
    tpu.vector_store %arg4[%c0_4, %c0_5, %c0_6], %4 {strides = array<i32>} : memref<2x2x128xf32, #tpu.memory_space<vmem>>, vector<2x2x128xf32>,
    return
  }
  func.func @transform_0(%arg0: i32, %arg1: i32) -> (i32, i32, i32) {
    %c0_i32 = arith.constant 0 : i32
    %c0_i32_0 = arith.constant 0 : i32
    return %arg1, %arg0, %c0_i32 : i32, i32, i32
  }
  func.func @transform_1(%arg0: i32, %arg1: i32) -> (i32, i32) {
    %c0_i32 = arith.constant 0 : i32
    %c0_i32_0 = arith.constant 0 : i32
    return %arg0, %c0_i32 : i32, i32
  }
  func.func @transform_2(%arg0: i32, %arg1: i32) -> (i32, i32, i32) {
    %c0_i32 = arith.constant 0 : i32
    %c0_i32_0 = arith.constant 0 : i32
    return %arg1, %arg0, %c0_i32 : i32, i32, i32
  }
}

</mosaic_0001>

<bundles_post_ra>
// kernel: tpu_custom_call.1
= control target key start
LH: loop header
LB: loop body
LE: loop exit
PB: predicated region body
PF: predicated region fallthrough
CT: control target
= control target key end

     0   :  { %7 = vsyncpa [#allocation3], 0  ;;  %s138_s0 = inlined_call_operand.hbm [shape: f32[2,2,128], index: 0, kind: input, shape index: {}, may-alias: {0,2}]   ;;  %s139_s1 = inlined_call_operand.vmem [shape: f32[2,128], index: 1, kind: input, shape index: {}]   ;;  %s140_s2 = inlined_call_operand.hbm [shape: f32[2,2,128], index: 2, kind: output, shape index: {}, may-alias: {0,2}]  }
   0x1   :  { %8 = vsyncpa [#allocation4], 0  ;;  %s13_s11 = sshll.u32 %s138_s0, 4  ;;  %s110_s12 = smov [#allocation2]   ;;  %s14_s11 = int_to_ptr.hbm [resolvable:$true] %s13_s11 }
   0x2   :  { %s15_s13 = sshll.u32 %s110_s12, 4  ;;  %s111_s14 = smov 32   ;;  %s16_s13 = int_to_ptr.vmem [resolvable:$true] %s15_s13 }
   0x3   :  { %s112_s15 = smov 2  }
   0x4   :  { %21 = dma.hbm_to_vmem [thread:$0]  %s14_s11, 64, %s16_s13, [#allocation3], %s111_s14, %s111_s14, %s112_s15  }
   0x5   :  { %106 = dma.done.wait [#allocation3], 64  }
   0x6   :  { %107 = vsyncadd [#allocation3], 4294967232  ;;  %s113_s16 = smov [#allocation5]   ;;  %s41_s20 = sshll.u32 %s140_s2, 4  ;;  %v28_v0 = vld [vmem:[#allocation2] sm:$0x3]  ;;  %s42_s20 = int_to_ptr.hbm [resolvable:$true] %s41_s20 }
   0x7   :  { %s39_s17 = sshll.u32 %s113_s16, 4  ;;  %v30_v1 = vld [vmem:[%s139_s1] sm:$0x3]  ;;  %v29_v2 = vld [vmem:[#allocation2 + $0x2] sm:$0x3]  ;;  %s40_s17 = int_to_ptr.vmem [resolvable:$true] %s39_s17 }
   0x8   :  { %v31_v3 = vadd.f32 %v30_v1, %v28_v0  ;;  %v32_v4 = vadd.f32 %v30_v1, %v29_v2 }
   0xa   :  { %33 = vst [vmem:[#allocation5] sm:$0x3] %v31_v3 }
   0xb   :  { %34 = vst [vmem:[#allocation5 + $0x2] sm:$0x3] %v32_v4 }
   0xc   :  { %47 = dma.vmem_to_hbm [thread:$0]  %s40_s17, 64, %s42_s20, [#allocation4], %s111_s14, %s111_s14, %s112_s15  }
   0xd   :  { %108 = dma.done.wait [#allocation4], 64  }
   0xe   :  { %109 = vsyncadd [#allocation4], 4294967232 }
   0xf   :  { %52 = vsyncpa [#allocation3], 1 }
  0x10   :  { %53 = vsyncpa [#allocation4], 1 }

</bundles_post_ra>
